<compile_context>
chip_gen: v7x
topology: tpu7x:2x2x1
jax: 0.10.0
libtpu: 0.0.40
codegen_flags: <defaults>
</compile_context>

<pallas_src>
import functools
import math

import jax
import jax.numpy as jnp
from jax.experimental import pallas as pl
from jax.experimental.pallas import tpu as pltpu

EPS = 1e-5

_VMEM_LIMIT = 32 * 1024 * 1024       # scoped-VMEM request: legal on v5e/v6e/v7x
_TILE_BUDGET = 4 * 1024 * 1024       # per-buffer tile budget (4 bufs << 32 MiB)
_RESIDENT_BYTES = 2 * 1024 * 1024    # fused path when an f32 copy of x fits here


def _round_up(x, m):
    return (x + m - 1) // m * m


def _pick_pack_factor(n_rows, c):
    """Smallest k with (k*C) % 128 == 0; used only when it divides N exactly."""
    if c % 128 == 0:
        return 1
    k = 128 // math.gcd(c, 128)
    return k if (k > 1 and n_rows % k == 0) else 1


def _choose_tile_rows(rows, bytes_per_row, itemsize, budget):
    """Tile rows: multiple of the dtype sublane minimum, ~budget bytes per tile,
    and (for large arrays) >= ~8 tiles so the parallel apply axis keeps both v7x
    TensorCores busy."""
    sub = max(8, 32 // max(1, itemsize))      # 8 / 16 / 32 for f32 / bf16 / int8
    cap = max(sub, (budget // bytes_per_row) // sub * sub)
    if rows <= cap:
        return rows                            # single full-extent block (legal)
    floor_tn = min(cap, max(sub, ((budget // 4) // bytes_per_row) // sub * sub))
    tn_eight = _round_up(-(-rows // 8), sub)   # ceil(rows/8), sublane-rounded
    return max(floor_tn, min(cap, tn_eight))


# ----------------------------- kernels --------------------------------------


def _fused_kernel(x_ref, w_ref, b_ref, o_ref, *, eps, inv_n):
    # Whole (N, C) array resident: stats + normalize in one shot (x read once).
    xf = x_ref[...].astype(jnp.float32)                    # (N, C)
    off = xf[0:1, :]                                       # per-channel shift (stability)
    xc = xf - off
    m1 = jnp.sum(xc, axis=0, keepdims=True) * inv_n        # E[x - off]
    m2 = jnp.sum(xc * xc, axis=0, keepdims=True) * inv_n   # E[(x - off)^2]
    var = jnp.maximum(m2 - m1 * m1, 0.0)                   # biased variance
    scale = w_ref[...] * jax.lax.rsqrt(var + eps)
    shift = b_ref[...] - (off + m1) * scale
    o_ref[...] = (xf * scale + shift).astype(o_ref.dtype)


def _make_stats_kernel(rows, tile_rows, masked):
    def kernel(x_ref, off_ref, acc_ref):
        # x_ref: (TN, KC) tile; acc_ref: (2, KC) resident f32 accumulator
        # (row 0 = sum of (x - off), row 1 = sum of (x - off)^2).
        @pl.when(pl.program_id(0) == 0)
        def _():
            acc_ref[...] = jnp.zeros_like(acc_ref)

        xc = x_ref[...].astype(jnp.float32) - off_ref[...]
        if masked:  # ragged last tile: zero the out-of-range rows (garbage data)
            valid = rows - pl.program_id(0) * tile_rows
            row_ids = jax.lax.broadcasted_iota(jnp.int32, xc.shape, 0)
            xc = jnp.where(row_ids < valid, xc, 0.0)
        acc_ref[0:1, :] = acc_ref[0:1, :] + jnp.sum(xc, axis=0, keepdims=True)
        acc_ref[1:2, :] = acc_ref[1:2, :] + jnp.sum(xc * xc, axis=0, keepdims=True)

    return kernel


def _apply_kernel(x_ref, scale_ref, shift_ref, o_ref):
    # y = x * scale + shift (scale/shift already hold the folded affine params).
    y = x_ref[...].astype(jnp.float32) * scale_ref[...] + shift_ref[...]
    o_ref[...] = y.astype(o_ref.dtype)


# ----------------------------- wrapper --------------------------------------


def my_batchnorm1d(x, weight, bias, eps=EPS, *,
                   force_two_pass=False, tile_budget_bytes=_TILE_BUDGET):
    """BatchNorm1d over the channel (last) dim of a (B, L, C) tensor,
    training-mode batch statistics (matches the PyTorch module's forward)."""
    B, L, C = x.shape
    N = B * L
    itemsize = jnp.dtype(x.dtype).itemsize

    x2d = x.reshape(N, C)
    w32 = weight.astype(jnp.float32).reshape(1, C)
    b32 = bias.astype(jnp.float32).reshape(1, C)

    # ---- fused resident path: read x from HBM exactly once ------------------
    if (not force_two_pass) and N * C * 4 <= _RESIDENT_BYTES:
        out2d = pl.pallas_call(
            functools.partial(_fused_kernel, eps=eps, inv_n=1.0 / N),
            out_shape=jax.ShapeDtypeStruct((N, C), x.dtype),
            grid=(1,),
            in_specs=[pl.BlockSpec((N, C), lambda i: (0, 0)),
                      pl.BlockSpec((1, C), lambda i: (0, 0)),
                      pl.BlockSpec((1, C), lambda i: (0, 0))],
            out_specs=pl.BlockSpec((N, C), lambda i: (0, 0)),
            compiler_params=pltpu.CompilerParams(
                dimension_semantics=("arbitrary",),
                vmem_limit_bytes=_VMEM_LIMIT),
        )(x2d, w32, b32)
        return out2d.reshape(B, L, C)

    # ---- tiled two-pass path -------------------------------------------------
    # Lane densification: view (N, C) as (rows, k*C) so the lane dim is a multiple
    # of 128 (unmasked vector stores) whenever k divides N; free metadata reshape.
    k = _pick_pack_factor(N, C)
    KC = k * C
    rows = N // k
    xr = x2d.reshape(rows, KC)

    bytes_per_row = KC * itemsize
    TN = _choose_tile_rows(rows, bytes_per_row, itemsize, tile_budget_bytes)
    n_tiles = -(-rows // TN)
    masked = (rows % TN) != 0            # ragged last tile handled in-kernel

    # Per-channel offset (first row of x) subtracted before squaring keeps the
    # one-pass E[x^2]-mean^2 variance numerically sane for large-mean data.
    off_c = x2d[0, :].astype(jnp.float32)
    off_kc = jnp.tile(off_c, k).reshape(1, KC)

    # pass 1: per-lane sum / sum-of-squares, accumulated across row tiles.
    acc = pl.pallas_call(
        _make_stats_kernel(rows, TN, masked),
        out_shape=jax.ShapeDtypeStruct((2, KC), jnp.float32),
        grid=(n_tiles,),
        in_specs=[pl.BlockSpec((TN, KC), lambda i: (i, 0)),
                  pl.BlockSpec((1, KC), lambda i: (0, 0))],
        out_specs=pl.BlockSpec((2, KC), lambda i: (0, 0)),   # resident accumulator
        compiler_params=pltpu.CompilerParams(
            dimension_semantics=("arbitrary",),
            vmem_limit_bytes=_VMEM_LIMIT),
    )(xr, off_kc)

    # Fold the k lane groups back to C channels; finalize stats (tiny C-sized math).
    acc_c = acc.reshape(2, k, C).sum(axis=1)                 # (2, C)
    m1 = acc_c[0] / N
    m2 = acc_c[1] / N
    mean = off_c + m1
    var = jnp.maximum(m2 - m1 * m1, 0.0)                     # biased variance
    scale = weight.astype(jnp.float32) * jax.lax.rsqrt(var + eps)
    shift = bias.astype(jnp.float32) - mean * scale
    scale_kc = jnp.tile(scale, k).reshape(1, KC)             # lane j -> scale[j % C]
    shift_kc = jnp.tile(shift, k).reshape(1, KC)

    # pass 2: y = x * scale + shift, pipelined over row tiles ("parallel" so the
    # tiles shard across v7x's two TensorCores; no-op on v5e/v6e).
    out_r = pl.pallas_call(
        _apply_kernel,
        out_shape=jax.ShapeDtypeStruct((rows, KC), x.dtype),
        grid=(n_tiles,),
        in_specs=[pl.BlockSpec((TN, KC), lambda i: (i, 0)),
                  pl.BlockSpec((1, KC), lambda i: (0, 0)),
                  pl.BlockSpec((1, KC), lambda i: (0, 0))],
        out_specs=pl.BlockSpec((TN, KC), lambda i: (i, 0)),
        compiler_params=pltpu.CompilerParams(
            dimension_semantics=("parallel",),
            vmem_limit_bytes=_VMEM_LIMIT),
    )(xr, scale_kc, shift_kc)

    return out_r.reshape(B, L, C)


# ----------------------------- reference & test ------------------------------


def _reference(x, weight, bias, eps=EPS):
    # Pure-JAX reference of the PyTorch forward (training-mode batch stats).
    xf = x.astype(jnp.float32)
    mean = jnp.mean(xf, axis=(0, 1), keepdims=True)
    var = jnp.mean((xf - mean) ** 2, axis=(0, 1), keepdims=True)  # biased
    y = (xf - mean) / jnp.sqrt(var + eps)
    return (y * weight.reshape(1, 1, -1) + bias.reshape(1, 1, -1)).astype(x.dtype)


if __name__ == "__main__":
    key = jax.random.PRNGKey(0)
    kx, kw, kb, kx2 = jax.random.split(key, 4)

    # Case 1: fused resident path (whole x fits in VMEM).  num_features = C = 32.
    B, L, C = 2, 8, 32
    x = jax.random.normal(kx, (B, L, C), dtype=jnp.float32) + 3.0   # nonzero mean
    weight = 1.0 + 0.1 * jax.random.normal(kw, (C,), dtype=jnp.float32)
    bias = 0.1 * jax.random.normal(kb, (C,), dtype=jnp.float32)
    ref = _reference(x, weight, bias)

    bn = jax.jit(my_batchnorm1d)
    out = jax.block_until_ready(bn(x, weight, bias))
    assert out.shape == (B, L, C)
    assert jnp.allclose(out, ref, atol=1e-4, rtol=1e-5), (
        f"fused path max abs err {float(jnp.max(jnp.abs(out - ref)))}")

    # Case 2: tiled two-pass path with lane-dense packing (C=32 -> 128 lanes).
    bn_tiled = jax.jit(functools.partial(my_batchnorm1d, force_two_pass=True))
    out2 = jax.block_until_ready(bn_tiled(x, weight, bias))
    assert jnp.allclose(out2, ref, atol=1e-4, rtol=1e-5), (
        f"two-pass path max abs err {float(jnp.max(jnp.abs(out2 - ref)))}")

    # Case 3: ragged tiling + in-kernel masking (C=48 doesn't pack for N=74; a tiny
    # tile budget forces several tiles with a partial last tile).
    B3, L3, C3 = 2, 37, 48
    x3 = jax.random.normal(kx2, (B3, L3, C3), dtype=jnp.float32) - 1.5
    w3 = jnp.ones((C3,), jnp.float32)
    b3 = jnp.zeros((C3,), jnp.float32)
    bn_ragged = jax.jit(functools.partial(my_batchnorm1d, force_two_pass=True,
                                          tile_budget_bytes=4096))
    out3 = jax.block_until_ready(bn_ragged(x3, w3, b3))
    ref3 = _reference(x3, w3, b3)
    assert jnp.allclose(out3, ref3, atol=1e-4, rtol=1e-5), (
        f"ragged path max abs err {float(jnp.max(jnp.abs(out3 - ref3)))}")

    print("KERNEL_OK")
</pallas_src>

<mosaic_0001>
module attributes {stable_mosaic.version = 11 : i64} {
  func.func @_fused_kernel(%arg0: i32, %arg1: memref<16x32xf32, #tpu.memory_space<vmem>>, %arg2: memref<1x32xf32, #tpu.memory_space<vmem>>, %arg3: memref<1x32xf32, #tpu.memory_space<vmem>>, %arg4: memref<16x32xf32, #tpu.memory_space<vmem>>) attributes {dimension_semantics = [#tpu.dimension_semantics<arbitrary>], iteration_bounds = array<i64: 1>, scalar_prefetch = 0 : i64, scratch_operands = 0 : i64, tpu.core_type = #tpu.core_type<tc>, window_params = [{pipeline_mode = #tpu.pipeline_mode<synchronous>, transform_indices = @transform_0, window_bounds = array<i64: 16, 32>}, {pipeline_mode = #tpu.pipeline_mode<synchronous>, transform_indices = @transform_1, window_bounds = array<i64: 1, 32>}, {pipeline_mode = #tpu.pipeline_mode<synchronous>, transform_indices = @transform_2, window_bounds = array<i64: 1, 32>}, {pipeline_mode = #tpu.pipeline_mode<synchronous>, transform_indices = @transform_3, window_bounds = array<i64: 16, 32>}]} {
    %c0 = arith.constant 0 : index
    %c0_0 = arith.constant 0 : index
    %0 = vector.load %arg1[%c0, %c0_0] : memref<16x32xf32, #tpu.memory_space<vmem>>, vector<16x32xf32>
    %1 = vector.extract_strided_slice %0 {offsets = [0, 0], sizes = [1, 32], strides = [1, 1]} : vector<16x32xf32> to vector<1x32xf32>
    %2 = vector.broadcast %1 : vector<1x32xf32> to vector<16x32xf32>
    %3 = arith.subf %0, %2 : vector<16x32xf32>
    %cst = arith.constant dense<0.000000e+00> : vector<32xf32>
    %4 = vector.multi_reduction <add>, %3, %cst [0] : vector<16x32xf32> to vector<32xf32>
    %5 = vector.shape_cast %4 : vector<32xf32> to vector<1x32xf32>
    %cst_1 = arith.constant 6.250000e-02 : f32
    %6 = vector.broadcast %cst_1 : f32 to vector<1x32xf32>
    %7 = arith.mulf %5, %6 : vector<1x32xf32>
    %8 = arith.mulf %3, %3 : vector<16x32xf32>
    %cst_2 = arith.constant dense<0.000000e+00> : vector<32xf32>
    %9 = vector.multi_reduction <add>, %8, %cst_2 [0] : vector<16x32xf32> to vector<32xf32>
    %10 = vector.shape_cast %9 : vector<32xf32> to vector<1x32xf32>
    %cst_3 = arith.constant 6.250000e-02 : f32
    %11 = vector.broadcast %cst_3 : f32 to vector<1x32xf32>
    %12 = arith.mulf %10, %11 : vector<1x32xf32>
    %13 = arith.mulf %7, %7 : vector<1x32xf32>
    %14 = arith.subf %12, %13 : vector<1x32xf32>
    %cst_4 = arith.constant 0.000000e+00 : f32
    %15 = vector.broadcast %cst_4 : f32 to vector<1x32xf32>
    %16 = arith.maximumf %14, %15 : vector<1x32xf32>
    %c0_5 = arith.constant 0 : index
    %c0_6 = arith.constant 0 : index
    %17 = vector.load %arg2[%c0_5, %c0_6] : memref<1x32xf32, #tpu.memory_space<vmem>>, vector<1x32xf32>
    %cst_7 = arith.constant 9.99999974E-6 : f32
    %18 = vector.broadcast %cst_7 : f32 to vector<1x32xf32>
    %19 = arith.addf %16, %18 : vector<1x32xf32>
    %20 = math.rsqrt %19 : vector<1x32xf32>
    %21 = arith.mulf %17, %20 : vector<1x32xf32>
    %c0_8 = arith.constant 0 : index
    %c0_9 = arith.constant 0 : index
    %22 = vector.load %arg3[%c0_8, %c0_9] : memref<1x32xf32, #tpu.memory_space<vmem>>, vector<1x32xf32>
    %23 = arith.addf %1, %7 : vector<1x32xf32>
    %24 = arith.mulf %23, %21 : vector<1x32xf32>
    %25 = arith.subf %22, %24 : vector<1x32xf32>
    %26 = vector.broadcast %21 : vector<1x32xf32> to vector<16x32xf32>
    %27 = arith.mulf %0, %26 : vector<16x32xf32>
    %28 = vector.broadcast %25 : vector<1x32xf32> to vector<16x32xf32>
    %29 = arith.addf %27, %28 : vector<16x32xf32>
    %c0_10 = arith.constant 0 : index
    %c0_11 = arith.constant 0 : index
    %30 = vector.load %arg4[%c0_10, %c0_11] : memref<16x32xf32, #tpu.memory_space<vmem>>, vector<16x32xf32>
    tpu.vector_store %arg4[%c0_10, %c0_11], %29 {strides = array<i32>} : memref<16x32xf32, #tpu.memory_space<vmem>>, vector<16x32xf32>,
    return
  }
  func.func @transform_0(%arg0: i32) -> (i32, i32) {
    %c0_i32 = arith.constant 0 : i32
    %c0_i32_0 = arith.constant 0 : i32
    %c0_i32_1 = arith.constant 0 : i32
    return %c0_i32, %c0_i32_0 : i32, i32
  }
  func.func @transform_1(%arg0: i32) -> (i32, i32) {
    %c0_i32 = arith.constant 0 : i32
    %c0_i32_0 = arith.constant 0 : i32
    %c0_i32_1 = arith.constant 0 : i32
    return %c0_i32, %c0_i32_0 : i32, i32
  }
  func.func @transform_2(%arg0: i32) -> (i32, i32) {
    %c0_i32 = arith.constant 0 : i32
    %c0_i32_0 = arith.constant 0 : i32
    %c0_i32_1 = arith.constant 0 : i32
    return %c0_i32, %c0_i32_0 : i32, i32
  }
  func.func @transform_3(%arg0: i32) -> (i32, i32) {
    %c0_i32 = arith.constant 0 : i32
    %c0_i32_0 = arith.constant 0 : i32
    %c0_i32_1 = arith.constant 0 : i32
    return %c0_i32, %c0_i32_0 : i32, i32
  }
}

</mosaic_0001>

<bundles_post_ra>
// kernel: my_batchnorm1d.1
= control target key start
LH: loop header
LB: loop body
LE: loop exit
PB: predicated region body
PF: predicated region fallthrough
CT: control target
= control target key end

     0   :  { %8 = vsyncpa [#allocation3], 0  ;;  %s226_s0 = inlined_call_operand.hbm [shape: f32[16,32], index: 0, kind: input, shape index: {}]   ;;  %s227_s1 = inlined_call_operand.vmem [shape: f32[1,32], index: 1, kind: input, shape index: {}]   ;;  %s228_s2 = inlined_call_operand.vmem [shape: f32[1,32], index: 2, kind: input, shape index: {}]   ;;  %s229_s3 = inlined_call_operand.hbm [shape: f32[16,32], index: 3, kind: output, shape index: {}]  }
   0x1   :  { %9 = vsyncpa [#allocation4], 0  ;;  %s160_s12 = smov [#allocation2]   ;;  %s112_s16 = scalar_lea.hbm %s226_s0, 256 }
   0x2   :  { %s15_s13 = sshll.u32 %s160_s12, 4  ;;  %p113_p0 = scmp.ne.s32.totalorder %s226_s0, %s112_s16  ;;  %s16_s13 = int_to_ptr.vmem [resolvable:$true] %s15_s13 }
   0x3   :  { %p116_p1 = scmp.lt.u32.totalorder %s112_s16, %s226_s0 }
   0x5   :  { %p118_p2 = pnand %p116_p1, %p113_p0 }
   0x7   :  { %121 = shalt.err (!%p118_p2)
}
   0x8   :  { %s122_s21 = scalar_lea.vmem %s16_s13, 256  ;;  %p127_p4 = scmp.lt.s32.totalorder %s16_s13, %s16_s13 }
   0x9   :  { %p123_p3 = scmp.ne.s32.totalorder %s16_s13, %s122_s21  ;;  %p128_p5 = scmp.lt.s32.totalorder %s122_s21, %s122_s21 }
   0xb   :  { %p129_p6 = por %p128_p5, %p127_p4 }
   0xd   :  { %p130_p7 = pnand %p129_p6, %p123_p3 }
   0xf   :  { %133 = shalt.err (!%p130_p7)
}
  0x10   :  { %s161_s22 = smov 128   ;;  %s162_s23 = smov 8  }
  0x11   :  { %21 = dma.hbm_to_vmem [thread:$0]  %s226_s0, 256, %s16_s13, [#allocation3], %s161_s22, %s161_s22, %s162_s23  }
  0x12   :  { %156 = dma.done.wait [#allocation3], 256  }
  0x13   :  { %157 = vsyncadd [#allocation3], 4294967040  ;;  %v31_v0 = vlaneseq  ;;  %v29_v3 = vld [vmem:[#allocation2] sm:$0xff]  ;;  %v30_v4 = vld [vmem:[#allocation2 + $0x8] sm:$0xff]  ;;  %vm37_vm0 = vcmask 261120   ;;  %s163_s29 = smov [#allocation5]  }
  0x14   :  { %v63_v34 = vld [vmem:[%s227_s1] sm:$0x1]  ;;  %s94_s30 = sshll.u32 %s163_s29, 4  ;;  %s95_s30 = int_to_ptr.vmem [resolvable:$true] %s94_s30 }
  0x15   :  { %v32_v1 = vshrl.u32 %v31_v0, 7  ;;  %v67_v38 = vld [vmem:[%s228_s2] sm:$0x1]  ;;  %s134_s1 = scalar_lea.vmem %s95_s30, 256  ;;  %p139_p9 = scmp.lt.s32.totalorder %s95_s30, %s95_s30 }
  0x16   :  { %p135_p8 = scmp.ne.s32.totalorder %s95_s30, %s134_s1  ;;  %p140_p10 = scmp.lt.s32.totalorder %s134_s1, %s134_s1 }
  0x17   :  { %v33_v2 = vsub.s32 0, %v32_v1 }
  0x18   :  { %p141_p11 = por %p140_p10, %p139_p9 }
  0x19   :  { %v34_v5 = vrot.slane %v29_v3, %v33_v2 }
  0x1a   :  { %p142_p12 = pnand %p141_p11, %p135_p8 }
  0x1b   :  { %v35_v6 = vsub.f32 %v29_v3, %v34_v5  ;;  %v36_v7 = vsub.f32 %v30_v4, %v34_v5 }
  0x1d   :  { %v38_v8 = vsel %vm37_vm0, %v35_v6, 0.0  ;;  %v39_v9 = vsel %vm37_vm0, %v36_v7, 0.0  ;;  %v48_v10 = vmul.f32 %v35_v6, %v35_v6  ;;  %v49_v11 = vmul.f32 %v36_v7, %v36_v7 }
  0x1e   :  { %v40_v12 = vadd.f32 %v39_v9, %v38_v8 }
  0x1f   :  { %v50_v13 = vsel %vm37_vm0, %v48_v10, 0.0  ;;  %v51_v14 = vsel %vm37_vm0, %v49_v11, 0.0 }
  0x20   :  { %v41_v15 = vrot.slane %v40_v12, 4  ;;  %v52_v16 = vadd.f32 %v51_v14, %v50_v13 }
  0x22   :  { %v42_v17 = vadd.f32 %v41_v15, %v40_v12  ;;  %v53_v18 = vrot.slane %v52_v16, 4 }
  0x24   :  { %v43_v19 = vrot.slane %v42_v17, 2  ;;  %v54_v20 = vadd.f32 %v53_v18, %v52_v16 }
  0x26   :  { %v44_v21 = vadd.f32 %v43_v19, %v42_v17  ;;  %v55_v22 = vrot.slane %v54_v20, 2 }
  0x28   :  { %v45_v23 = vrot.slane %v44_v21, 1  ;;  %v56_v24 = vadd.f32 %v55_v22, %v54_v20 }
  0x2a   :  { %v46_v25 = vadd.f32 %v45_v23, %v44_v21  ;;  %v57_v26 = vrot.slane %v56_v24, 1 }
  0x2c   :  { %v47_v27 = vmul.f32 0.0625, %v46_v25  ;;  %v58_v28 = vadd.f32 %v57_v26, %v56_v24 }
  0x2e   :  { %v59_v29 = vmul.f32 0.0625, %v58_v28  ;;  %v60_v30 = vmul.f32 %v47_v27, %v47_v27  ;;  %v68_v35 = vadd.f32 %v47_v27, %v29_v3 }
  0x30   :  { %v61_v31 = vsub.f32 %v59_v29, %v60_v30 }
  0x32   :  { %v62_v32 = vmax.f32 %v61_v31, 0.0 }
  0x34   :  { %v64_v33 = vadd.f32 1e-05, %v62_v32 }
  0x36   :  { %110 = vrsqrt.f32 %v64_v33 }
  0x40   :  { %v111_v36 = vpop.eup %110 }
  0x41   :  { %v66_v37 = vmul.f32 %v111_v36, %v63_v34 }
  0x43   :  { %v69_v39 = vmul.f32 %v68_v35, %v66_v37  ;;  %v75_v40 = vrot.slane %v66_v37, %v33_v2 }
  0x45   :  { %v70_v41 = vsub.f32 %v67_v38, %v69_v39  ;;  %v77_v42 = vmul.f32 %v75_v40, %v29_v3  ;;  %v78_v43 = vmul.f32 %v75_v40, %v30_v4 }
  0x47   :  { %v83_v44 = vrot.slane %v70_v41, %v33_v2 }
  0x49   :  { %v85_v45 = vadd.f32 %v83_v44, %v77_v42  ;;  %v86_v46 = vadd.f32 %v83_v44, %v78_v43 }
  0x4b   :  { %87 = vst.msk [vmem:[#allocation5] sm:$0xff] %vm37_vm0, %v85_v45  ;;  %88 = vst.msk [vmem:[#allocation5 + $0x8] sm:$0xff] %vm37_vm0, %v86_v46 }
  0x4c   :  { %145 = shalt.err (!%p142_p12)
}
  0x4d   :  { %s146_s5 = scalar_lea.hbm %s229_s3, 256 }
  0x4e   :  { %p147_p13 = scmp.ne.s32.totalorder %s229_s3, %s146_s5  ;;  %p150_p0 = scmp.lt.u32.totalorder %s146_s5, %s229_s3 }
  0x50   :  { %p152_p1 = pnand %p150_p0, %p147_p13 }
  0x52   :  { %155 = shalt.err (!%p152_p1)
}
  0x53   :  { %100 = dma.vmem_to_hbm [thread:$0]  %s95_s30, 256, %s229_s3, [#allocation4], %s161_s22, %s161_s22, %s162_s23  }
  0x54   :  { %158 = dma.done.wait [#allocation4], 256  }
  0x55   :  { %159 = vsyncadd [#allocation4], 4294967040 }
  0x56   :  { %104 = vsyncpa [#allocation3], 1 }
  0x57   :  { %105 = vsyncpa [#allocation4], 1 }

</bundles_post_ra>
